<compile_context>
chip_gen: v7x
topology: tpu7x:2x2x1
jax: 0.10.0
libtpu: 0.0.40
codegen_flags: <defaults>
</compile_context>

<pallas_src>
import jax
import jax.numpy as jnp
from jax.experimental import pallas as pl
from jax.experimental.pallas import tpu as pltpu

_LANES = 1024                 # lane-dense width (multiple of 128) -> full, unmasked vst
_SUBLANE_ALIGN = 32           # covers f32(8) / bf16(16) / int8(32) sublane packing
_TARGET_TILE_BYTES = 4 << 20  # ~4 MiB per pipeline buffer (double-buffered in+out ~16 MiB)


def _round_up(n, m):
    return ((n + m - 1) // m) * m


def _scale_kernel(scale_ref, x_ref, o_ref):
    # scale_ref: SMEM (1,) f32 scalar; x_ref / o_ref: lane-dense VMEM tiles.
    # Multiply in f32 (matches the f32 nn.Parameter), cast to the promoted out dtype.
    o_ref[...] = (x_ref[...].astype(jnp.float32) * scale_ref[0]).astype(o_ref.dtype)


def scale_forward(x, scale):
    """y = x * scale (learnable scalar) via a lane-dense, HBM-bandwidth-bound Pallas kernel."""
    orig_shape = x.shape
    total = x.size
    # PyTorch promotion semantics: tensor * f32 Parameter -> at least f32.
    out_dtype = jnp.result_type(x.dtype, jnp.float32)

    if total == 0:
        return jnp.zeros(orig_shape, out_dtype)

    scale_arr = jnp.asarray(scale, dtype=jnp.float32).reshape((1,))
    flat = x.reshape(-1)  # free (metadata only) for contiguous inputs

    # Rows of the lane-dense (rows, 1024) slab. The grid masks the ragged last
    # block, so rows is never rounded up to a whole tile.
    rows = pl.cdiv(total, _LANES)

    # Dtype-aware tile rows: constant byte budget per pipeline buffer.
    max_item = max(jnp.dtype(x.dtype).itemsize, jnp.dtype(out_dtype).itemsize)
    big_tile_rows = max(
        _SUBLANE_ALIGN,
        (_TARGET_TILE_BYTES // (_LANES * max_item)) // _SUBLANE_ALIGN * _SUBLANE_ALIGN,
    )

    # Aim for >= 2 grid steps whenever possible so both v7x TensorCores stream
    # (no effect on single-TC v5e/v6e); cap at the big-tile byte budget.
    tile_rows = min(big_tile_rows, _round_up(pl.cdiv(rows, 2), _SUBLANE_ALIGN))
    if tile_rows >= rows:
        tile_rows = rows  # tiny input: single block == full array dims

    # Pad ONLY the ragged tail (< one lane-row, <= 4 KiB). Typical det3d NCHW
    # sizes are multiples of 1024, so the common path has no pad / slice copies.
    padded = rows * _LANES
    if padded != total:
        flat = jnp.pad(flat, (0, padded - total))
    x2 = flat.reshape(rows, _LANES)

    grid = (pl.cdiv(rows, tile_rows),)

    out2 = pl.pallas_call(
        _scale_kernel,
        out_shape=jax.ShapeDtypeStruct((rows, _LANES), out_dtype),
        grid=grid,
        in_specs=[
            pl.BlockSpec(memory_space=pltpu.MemorySpace.SMEM),     # scale scalar
            pl.BlockSpec((tile_rows, _LANES), lambda i: (i, 0)),   # x tile
        ],
        out_specs=pl.BlockSpec((tile_rows, _LANES), lambda i: (i, 0)),
        compiler_params=pltpu.CompilerParams(
            dimension_semantics=("parallel",),   # megacore-shardable on v7x
            vmem_limit_bytes=32 * 1024 * 1024,   # 2 bufs x (in+out) x <=4 MiB + headroom
        ),
        # TODO(synk): if the caller can donate x (same dtype), add
        # input_output_aliases={1: 0} to reuse x's HBM buffer for the output.
    )(scale_arr, x2)

    out_flat = out2.reshape(-1)
    if padded != total:
        out_flat = out_flat[:total]  # ragged-tail fallback only
    return out_flat.reshape(orig_shape)


if __name__ == "__main__":
    key = jax.random.PRNGKey(0)

    # Small NCHW input consistent with typical usage of Scale in det3d heads.
    x = jax.random.normal(key, (2, 4, 16, 16), dtype=jnp.float32)
    scale_param = jnp.float32(1.5)  # Scale(scale=1.0)-style param, non-trivial value

    y = scale_forward(x, scale_param)
    y = jax.block_until_ready(y)

    ref = x * scale_param
    assert y.shape == x.shape and y.dtype == ref.dtype
    assert jnp.allclose(y, ref, atol=1e-6, rtol=1e-6)

    # Second check: exercises the no-pad, multi-block path with a masked
    # partial last block (rows=40, tile_rows=32, grid=(2,)).
    key2 = jax.random.PRNGKey(1)
    x2 = jax.random.normal(key2, (5, 8, 32, 32), dtype=jnp.float32)
    y2 = jax.block_until_ready(scale_forward(x2, scale_param))
    assert jnp.allclose(y2, x2 * scale_param, atol=1e-6, rtol=1e-6)

    print("KERNEL_OK")
</pallas_src>

<mosaic_0001>
module attributes {stable_mosaic.version = 11 : i64} {
  func.func @_scale_kernel(%arg0: i32, %arg1: memref<1xf32, #tpu.memory_space<smem>>, %arg2: memref<2x1024xf32, #tpu.memory_space<vmem>>, %arg3: memref<2x1024xf32, #tpu.memory_space<vmem>>) attributes {dimension_semantics = [#tpu.dimension_semantics<parallel>], iteration_bounds = array<i64: 1>, scalar_prefetch = 0 : i64, scratch_operands = 0 : i64, tpu.core_type = #tpu.core_type<tc>, window_params = [{transform_indices = @transform_0, window_bounds = array<i64: 1>}, {transform_indices = @transform_1, window_bounds = array<i64: 2, 1024>}, {transform_indices = @transform_2, window_bounds = array<i64: 2, 1024>}]} {
    %c0 = arith.constant 0 : index
    %c0_0 = arith.constant 0 : index
    %0 = vector.load %arg2[%c0, %c0_0] : memref<2x1024xf32, #tpu.memory_space<vmem>>, vector<2x1024xf32>
    %c0_1 = arith.constant 0 : index
    %1 = memref.load %arg1[%c0_1] : memref<1xf32, #tpu.memory_space<smem>>
    %2 = vector.broadcast %1 : f32 to vector<2x1024xf32>
    %3 = arith.mulf %0, %2 : vector<2x1024xf32>
    %c0_2 = arith.constant 0 : index
    %c0_3 = arith.constant 0 : index
    %4 = vector.load %arg3[%c0_2, %c0_3] : memref<2x1024xf32, #tpu.memory_space<vmem>>, vector<2x1024xf32>
    tpu.vector_store %arg3[%c0_2, %c0_3], %3 {strides = array<i32>} : memref<2x1024xf32, #tpu.memory_space<vmem>>, vector<2x1024xf32>,
    return
  }
  func.func @transform_0(%arg0: i32) -> i32 {
    %c0_i32 = arith.constant 0 : i32
    %c0_i32_0 = arith.constant 0 : i32
    return %c0_i32 : i32
  }
  func.func @transform_1(%arg0: i32) -> (i32, i32) {
    %c0_i32 = arith.constant 0 : i32
    %c0_i32_0 = arith.constant 0 : i32
    return %arg0, %c0_i32 : i32, i32
  }
  func.func @transform_2(%arg0: i32) -> (i32, i32) {
    %c0_i32 = arith.constant 0 : i32
    %c0_i32_0 = arith.constant 0 : i32
    return %arg0, %c0_i32 : i32, i32
  }
}

</mosaic_0001>

<bundles_post_ra>
// kernel: tpu_custom_call.1
= control target key start
LH: loop header
LB: loop body
LE: loop exit
PB: predicated region body
PF: predicated region fallthrough
CT: control target
= control target key end

     0   :  { %8 = vsyncpa [#allocation4], 0  ;;  %s142_s0 = inlined_call_operand.<no memory space> [shape: f32[1], index: 0, kind: input, shape index: {}]   ;;  %s143_s1 = inlined_call_operand.hbm [shape: f32[2,1024], index: 1, kind: input, shape index: {}]   ;;  %s144_s2 = inlined_call_operand.hbm [shape: f32[2,1024], index: 2, kind: output, shape index: {}]  }
   0x1   :  { %9 = vsyncpa [#allocation5], 0  ;;  %s98_s9 = smov [#allocation3]   ;;  %s50_s13 = scalar_lea.hbm %s143_s1, 256 }
   0x2   :  { %s18_s10 = sshll.u32 %s98_s9, 4  ;;  %p51_p0 = scmp.ne.s32.totalorder %s143_s1, %s50_s13  ;;  %s19_s10 = int_to_ptr.vmem [resolvable:$true] %s18_s10 }
   0x3   :  { %p54_p1 = scmp.lt.u32.totalorder %s50_s13, %s143_s1 }
   0x5   :  { %p56_p2 = pnand %p54_p1, %p51_p0 }
   0x7   :  { %59 = shalt.err (!%p56_p2)
}
   0x8   :  { %s60_s18 = scalar_lea.vmem %s19_s10, 256  ;;  %p65_p4 = scmp.lt.s32.totalorder %s19_s10, %s19_s10 }
   0x9   :  { %p61_p3 = scmp.ne.s32.totalorder %s19_s10, %s60_s18  ;;  %p66_p5 = scmp.lt.s32.totalorder %s60_s18, %s60_s18 }
   0xb   :  { %p67_p6 = por %p66_p5, %p65_p4 }
   0xd   :  { %p68_p7 = pnand %p67_p6, %p61_p3 }
   0xf   :  { %71 = shalt.err (!%p68_p7)
}
  0x10   :  { %21 = dma.hbm_to_vmem [thread:$0]  %s143_s1, 256, %s19_s10, [#allocation4]  }
  0x11   :  { %94 = dma.done.wait [#allocation4], 256  }
  0x12   :  { %95 = vsyncadd [#allocation4], 4294967040  ;;  %v28_v0 = vstv %s142_s0  ;;  %s99_s23 = smov [#allocation6]   ;;  %v25_v1 = vld [vmem:[#allocation3] sm:$0xff]  ;;  %v26_v2 = vld [vmem:[#allocation3 + $0x8] sm:$0xff] }
  0x13   :  { %s39_s24 = sshll.u32 %s99_s23, 4  ;;  %v29_v3 = vmul.f32 %v28_v0, %v25_v1  ;;  %v30_v4 = vmul.f32 %v28_v0, %v26_v2  ;;  %s40_s24 = int_to_ptr.vmem [resolvable:$true] %s39_s24 }
  0x14   :  { %s72_s25 = scalar_lea.vmem %s40_s24, 256  ;;  %p77_p9 = scmp.lt.s32.totalorder %s40_s24, %s40_s24 }
  0x15   :  { %31 = vst [vmem:[#allocation6] sm:$0xff] %v29_v3  ;;  %32 = vst [vmem:[#allocation6 + $0x8] sm:$0xff] %v30_v4  ;;  %p73_p8 = scmp.ne.s32.totalorder %s40_s24, %s72_s25  ;;  %p78_p10 = scmp.lt.s32.totalorder %s72_s25, %s72_s25 }
  0x17   :  { %p79_p11 = por %p78_p10, %p77_p9 }
  0x19   :  { %p80_p12 = pnand %p79_p11, %p73_p8 }
  0x1b   :  { %83 = shalt.err (!%p80_p12)
}
  0x1c   :  { %s84_s0 = scalar_lea.hbm %s144_s2, 256 }
  0x1d   :  { %p85_p13 = scmp.ne.s32.totalorder %s144_s2, %s84_s0  ;;  %p88_p0 = scmp.lt.u32.totalorder %s84_s0, %s144_s2 }
  0x1f   :  { %p90_p1 = pnand %p88_p0, %p85_p13 }
  0x21   :  { %93 = shalt.err (!%p90_p1)
}
  0x22   :  { %42 = dma.vmem_to_hbm [thread:$0]  %s40_s24, 256, %s144_s2, [#allocation5]  }
  0x23   :  { %96 = dma.done.wait [#allocation5], 256  }
  0x24   :  { %97 = vsyncadd [#allocation5], 4294967040 }
  0x25   :  { %46 = vsyncpa [#allocation4], 1 }
  0x26   :  { %47 = vsyncpa [#allocation5], 1 }

</bundles_post_ra>
